<compile_context>
chip_gen: v7x
topology: tpu7x:2x2x1
jax: 0.10.0
libtpu: 0.0.40
codegen_flags: <defaults>
</compile_context>

<pallas_src>
import functools

import jax
import jax.numpy as jnp
from jax.experimental import pallas as pl
from jax.experimental.pallas import tpu as pltpu


def _round_up(a, b):
    return ((a + b - 1) // b) * b


def _sublane_stride(c):
    """Smallest sublane stride >= c so per-tap blocks never straddle an 8-sublane boundary."""
    if c >= 8:
        return _round_up(c, 8)
    s = 1
    while s < c:
        s *= 2
    return s


def _pick_batch_block(n, target=8):
    """Largest divisor of n that is <= target, preferring grid length >= 2 (v7x megacore)."""
    target = max(1, min(target, n))
    divs = [d for d in range(1, target + 1) if n % d == 0]
    pref = [d for d in divs if n // d >= 2]
    return max(pref) if pref else max(divs)


def _conv_bn_relu_kernel(x_ref, w_ref, o_ref, xpad_ref, rhs_ref, *,
                         K, Cin, L, L_out, stride, padding, left_pad,
                         sub_stride, B_blk):
    # x_ref    : (B_blk, Cin, L)          unpadded input rows (input dtype)
    # w_ref    : (Cout, K*sub_stride + 1) f32 folded weight; last column = BN/bias shift
    # o_ref    : (B_blk, Cout, L_out)     output rows (input dtype), lane-dense NCL
    # xpad_ref : (Cin, L_xpad)            f32 scratch: zero-padded row (data at lane `left_pad`)
    # rhs_ref  : (K*sub_stride + 1, L_out) f32 scratch: im2col taps + ones row
    f32 = jnp.float32
    CK = K * sub_stride

    # Re-initialise scratch every grid step (a few vregs; keeps megacore sharding safe).
    xpad_ref[...] = jnp.zeros_like(xpad_ref)
    rhs_ref[...] = jnp.zeros_like(rhs_ref)
    rhs_ref[CK:CK + 1, :] = jnp.ones((1, L_out), f32)      # carries the folded bias/BN shift

    w = w_ref[...]                                          # (Cout, CK + 1), f32
    for b in range(B_blk):                                  # static unroll, B_blk <= ~8
        # On-chip conv padding: data starts at a 128-aligned lane offset so this
        # store is lane-aligned; only the tap *reads* below are lane-shifted.
        xpad_ref[:, left_pad:left_pad + L] = x_ref[b].astype(f32)
        for k in range(K):
            start = left_pad - padding + k
            if stride == 1:
                tap = xpad_ref[:, start:start + L_out]
            else:
                # TODO(synk): strided lane read; a dense load + in-VMEM de-interleave
                #             (pltpu.roll) would be cheaper for stride > 1.
                tap = xpad_ref[:, pl.ds(start, L_out, stride=stride)]
            rhs_ref[k * sub_stride:k * sub_stride + Cin, :] = tap
        acc = jnp.dot(w, rhs_ref[...], preferred_element_type=f32)   # (Cout, L_out)
        o_ref[b] = jnp.maximum(acc, 0.0).astype(o_ref.dtype)


def conv_block_forward(x, weight, bias, gamma, beta, running_mean, running_var,
                       *, padding=1, stride=1, eps=1e-5, batch_block=8,
                       training=False):
    """Fused Conv1d -> BatchNorm1d(eval) -> ReLU -> Dropout(eval = identity).

    x: (N, Cin, L); weight: (Cout, Cin, K). Returns (N, Cout, L_out) in x.dtype.
    Pass x as bfloat16 (e.g. from a bf16 activation pipeline) to halve input/output
    HBM traffic; all in-kernel compute stays float32.
    """
    if training:
        # TODO(synk): training-mode BatchNorm batch statistics + stochastic Dropout(0.1).
        raise NotImplementedError("conv_block_forward implements eval-mode semantics only")
    stride = 1 if stride is None else int(stride)

    N, Cin, L = x.shape
    Cout, _, K = weight.shape
    L_out = (L + 2 * padding - K) // stride + 1
    L_in_need = (L_out - 1) * stride + K
    pad_right = max(L_in_need - padding - L, 0)
    left_pad = _round_up(padding, 128) if padding > 0 else 0     # lane-aligned data start
    L_xpad = left_pad + L + pad_right

    # ---- fold conv bias + BatchNorm (running stats) into one weight + shift ----
    f32 = jnp.float32
    bn_scale = gamma.astype(f32) / jnp.sqrt(running_var.astype(f32) + eps)     # (Cout,)
    w_folded = weight.astype(f32) * bn_scale[:, None, None]                    # (Cout,Cin,K)
    shift = (bias.astype(f32) - running_mean.astype(f32)) * bn_scale + beta.astype(f32)
    sub = _sublane_stride(Cin)
    w_kc = jnp.transpose(w_folded, (0, 2, 1))                                  # (Cout,K,Cin)
    w_kc = jnp.pad(w_kc, ((0, 0), (0, 0), (0, sub - Cin)))                     # zero filler rows
    w_ext = jnp.concatenate([w_kc.reshape(Cout, K * sub), shift[:, None]], axis=-1)
    w_ext = w_ext.astype(f32)                                                  # (Cout, K*sub+1)

    B_blk = _pick_batch_block(N, batch_block)
    grid = (N // B_blk,)

    kernel = functools.partial(
        _conv_bn_relu_kernel, K=K, Cin=Cin, L=L, L_out=L_out, stride=stride,
        padding=padding, left_pad=left_pad, sub_stride=sub, B_blk=B_blk)

    # TODO(synk): for much larger Cout / L, add an L-tile grid axis and size blocks
    #             against v7x's 64 MiB VMEM / v5e's 16 MiB scoped default
    #             (set pltpu.CompilerParams(vmem_limit_bytes=...) if needed).
    return pl.pallas_call(
        kernel,
        out_shape=jax.ShapeDtypeStruct((N, Cout, L_out), x.dtype),
        grid_spec=pltpu.PrefetchScalarGridSpec(
            num_scalar_prefetch=0,
            grid=grid,
            in_specs=[
                # full (Cin, L) rows, B_blk per step; no HBM-side padding or rounding
                pl.BlockSpec((B_blk, Cin, L), lambda i: (i, 0, 0)),
                # folded weight: constant block index -> fetched once and reused
                pl.BlockSpec((Cout, K * sub + 1), lambda i: (0, 0)),
            ],
            # full, unpadded output rows -> already NCL, no trailing slice pass
            out_specs=pl.BlockSpec((B_blk, Cout, L_out), lambda i: (i, 0, 0)),
            scratch_shapes=[
                pltpu.VMEM((Cin, L_xpad), f32),
                pltpu.VMEM((K * sub + 1, L_out), f32),
            ],
        ),
        compiler_params=pltpu.CompilerParams(
            dimension_semantics=("parallel",)),
    )(x, w_ext)


def _reference(x, weight, bias, gamma, beta, running_mean, running_var,
               *, padding=1, stride=1, eps=1e-5):
    # plain-JAX reference: eval-mode Conv1d -> BatchNorm1d -> ReLU -> Dropout(identity)
    y = jax.lax.conv_general_dilated(
        x.astype(jnp.float32), weight.astype(jnp.float32),
        window_strides=(stride,), padding=[(padding, padding)],
        dimension_numbers=("NCH", "OIH", "NCH"),
        precision=jax.lax.Precision.HIGHEST)
    y = y + bias[None, :, None]
    scale = gamma / jnp.sqrt(running_var + eps)
    y = (y - running_mean[None, :, None]) * scale[None, :, None] + beta[None, :, None]
    return jnp.maximum(y, 0.0)


if __name__ == "__main__":
    # Small shapes consistent with the module (Conv1d over NCL input, Cin=3).
    # L deliberately not a multiple of 128 to exercise the unpadded-block path;
    # N=4 with B_blk=2 gives grid=(2,) so both v7x TensorCores get work.
    N, Cin, L = 4, 3, 200
    Cout, K, pad_, stride_ = 8, 3, 1, 1

    key = jax.random.PRNGKey(0)
    kx, kw, kb, kg, kbe, km, kv = jax.random.split(key, 7)
    x = jax.random.normal(kx, (N, Cin, L), dtype=jnp.float32)
    weight = 0.1 * jax.random.normal(kw, (Cout, Cin, K), dtype=jnp.float32)
    bias = 0.1 * jax.random.normal(kb, (Cout,), dtype=jnp.float32)
    gamma = 1.0 + 0.05 * jax.random.normal(kg, (Cout,), dtype=jnp.float32)
    beta = 0.05 * jax.random.normal(kbe, (Cout,), dtype=jnp.float32)
    running_mean = 0.05 * jax.random.normal(km, (Cout,), dtype=jnp.float32)
    running_var = 1.0 + 0.1 * jax.random.uniform(kv, (Cout,), dtype=jnp.float32)

    fwd = jax.jit(functools.partial(conv_block_forward, padding=pad_, stride=stride_))

    # float32 path
    out = jax.block_until_ready(
        fwd(x, weight, bias, gamma, beta, running_mean, running_var))
    ref = _reference(x, weight, bias, gamma, beta, running_mean, running_var,
                     padding=pad_, stride=stride_)
    assert out.shape == (N, Cout, L), out.shape
    err = float(jnp.max(jnp.abs(out - ref)))
    assert err < 1e-3, f"f32 path max abs err {err}"

    # bfloat16 activation path (simulates a bf16 pipeline: halves HBM traffic;
    # accumulation and epilogue remain f32 inside the kernel).
    x_bf16 = x.astype(jnp.bfloat16)
    out_bf16 = jax.block_until_ready(
        fwd(x_bf16, weight, bias, gamma, beta, running_mean, running_var))
    ref_bf16 = _reference(x_bf16.astype(jnp.float32), weight, bias, gamma, beta,
                          running_mean, running_var, padding=pad_, stride=stride_)
    assert out_bf16.dtype == jnp.bfloat16
    err_bf16 = float(jnp.max(jnp.abs(out_bf16.astype(jnp.float32) - ref_bf16)))
    assert err_bf16 < 3e-2, f"bf16 path max abs err {err_bf16}"

    print("KERNEL_OK")
</pallas_src>

<mosaic_0001>
module attributes {stable_mosaic.version = 11 : i64} {
  func.func @_conv_bn_relu_kernel(%arg0: i32, %arg1: memref<2x3x200xf32, #tpu.memory_space<vmem>>, %arg2: memref<8x13xf32, #tpu.memory_space<vmem>>, %arg3: memref<2x8x200xf32, #tpu.memory_space<vmem>>, %arg4: memref<3x329xf32, #tpu.memory_space<vmem>>, %arg5: memref<13x200xf32, #tpu.memory_space<vmem>>) attributes {dimension_semantics = [#tpu.dimension_semantics<parallel>], iteration_bounds = array<i64: 2>, scalar_prefetch = 0 : i64, scratch_operands = 2 : i64, tpu.core_type = #tpu.core_type<tc>, window_params = [{transform_indices = @transform_0, window_bounds = array<i64: 2, 3, 200>}, {pipeline_mode = #tpu.pipeline_mode<synchronous>, transform_indices = @transform_1, window_bounds = array<i64: 8, 13>}, {transform_indices = @transform_2, window_bounds = array<i64: 2, 8, 200>}]} {
    %cst = arith.constant 0.000000e+00 : f32
    %0 = vector.broadcast %cst : f32 to vector<3x329xf32>
    %c0 = arith.constant 0 : index
    %c0_0 = arith.constant 0 : index
    %1 = vector.load %arg4[%c0, %c0_0] : memref<3x329xf32, #tpu.memory_space<vmem>>, vector<3x329xf32>
    tpu.vector_store %arg4[%c0, %c0_0], %0 {strides = array<i32>} : memref<3x329xf32, #tpu.memory_space<vmem>>, vector<3x329xf32>,
    %cst_1 = arith.constant 0.000000e+00 : f32
    %2 = vector.broadcast %cst_1 : f32 to vector<13x200xf32>
    %c0_2 = arith.constant 0 : index
    %c0_3 = arith.constant 0 : index
    %3 = vector.load %arg5[%c0_2, %c0_3] : memref<13x200xf32, #tpu.memory_space<vmem>>, vector<13x200xf32>
    tpu.vector_store %arg5[%c0_2, %c0_3], %2 {strides = array<i32>} : memref<13x200xf32, #tpu.memory_space<vmem>>, vector<13x200xf32>,
    %cst_4 = arith.constant 1.000000e+00 : f32
    %4 = vector.broadcast %cst_4 : f32 to vector<1x200xf32>
    %c12 = arith.constant 12 : index
    %c0_5 = arith.constant 0 : index
    %5 = vector.load %arg5[%c12, %c0_5] : memref<13x200xf32, #tpu.memory_space<vmem>>, vector<1x200xf32>
    tpu.vector_store %arg5[%c12, %c0_5], %4 {strides = array<i32>} : memref<13x200xf32, #tpu.memory_space<vmem>>, vector<1x200xf32>,
    %c0_6 = arith.constant 0 : index
    %c0_7 = arith.constant 0 : index
    %6 = vector.load %arg2[%c0_6, %c0_7] : memref<8x13xf32, #tpu.memory_space<vmem>>, vector<8x13xf32>
    %c0_8 = arith.constant 0 : index
    %c0_9 = arith.constant 0 : index
    %c0_10 = arith.constant 0 : index
    %7 = vector.load %arg1[%c0_8, %c0_9, %c0_10] : memref<2x3x200xf32, #tpu.memory_space<vmem>>, vector<1x3x200xf32>
    %8 = vector.shape_cast %7 : vector<1x3x200xf32> to vector<3x200xf32>
    %c0_11 = arith.constant 0 : index
    %c128 = arith.constant 128 : index
    %9 = vector.load %arg4[%c0_11, %c128] : memref<3x329xf32, #tpu.memory_space<vmem>>, vector<3x200xf32>
    tpu.vector_store %arg4[%c0_11, %c128], %8 {strides = array<i32>} : memref<3x329xf32, #tpu.memory_space<vmem>>, vector<3x200xf32>,
    %c0_12 = arith.constant 0 : index
    %c127 = arith.constant 127 : index
    %10 = vector.load %arg4[%c0_12, %c127] : memref<3x329xf32, #tpu.memory_space<vmem>>, vector<3x200xf32>
    %c0_13 = arith.constant 0 : index
    %c0_14 = arith.constant 0 : index
    %11 = vector.load %arg5[%c0_13, %c0_14] : memref<13x200xf32, #tpu.memory_space<vmem>>, vector<3x200xf32>
    tpu.vector_store %arg5[%c0_13, %c0_14], %10 {strides = array<i32>} : memref<13x200xf32, #tpu.memory_space<vmem>>, vector<3x200xf32>,
    %c0_15 = arith.constant 0 : index
    %c128_16 = arith.constant 128 : index
    %12 = vector.load %arg4[%c0_15, %c128_16] : memref<3x329xf32, #tpu.memory_space<vmem>>, vector<3x200xf32>
    %c4 = arith.constant 4 : index
    %c0_17 = arith.constant 0 : index
    %13 = vector.load %arg5[%c4, %c0_17] : memref<13x200xf32, #tpu.memory_space<vmem>>, vector<3x200xf32>
    tpu.vector_store %arg5[%c4, %c0_17], %12 {strides = array<i32>} : memref<13x200xf32, #tpu.memory_space<vmem>>, vector<3x200xf32>,
    %c0_18 = arith.constant 0 : index
    %c129 = arith.constant 129 : index
    %14 = vector.load %arg4[%c0_18, %c129] : memref<3x329xf32, #tpu.memory_space<vmem>>, vector<3x200xf32>
    %c8 = arith.constant 8 : index
    %c0_19 = arith.constant 0 : index
    %15 = vector.load %arg5[%c8, %c0_19] : memref<13x200xf32, #tpu.memory_space<vmem>>, vector<3x200xf32>
    tpu.vector_store %arg5[%c8, %c0_19], %14 {strides = array<i32>} : memref<13x200xf32, #tpu.memory_space<vmem>>, vector<3x200xf32>,
    %c0_20 = arith.constant 0 : index
    %c0_21 = arith.constant 0 : index
    %16 = vector.load %arg5[%c0_20, %c0_21] : memref<13x200xf32, #tpu.memory_space<vmem>>, vector<13x200xf32>
    %cst_22 = arith.constant dense<0.000000e+00> : vector<8x200xf32>
    %17 = tpu.matmul %6, %16, %cst_22 {dimension_numbers = #tpu.dot_dimension_numbers<[1], [0], [0], [1], [0, 0, 1, 1], [], []>} : vector<8x13xf32>, vector<13x200xf32>, vector<8x200xf32> -> vector<8x200xf32>
    %cst_23 = arith.constant 0.000000e+00 : f32
    %18 = vector.broadcast %cst_23 : f32 to vector<8x200xf32>
    %19 = arith.maximumf %17, %18 : vector<8x200xf32>
    %c0_24 = arith.constant 0 : index
    %c0_25 = arith.constant 0 : index
    %c0_26 = arith.constant 0 : index
    %20 = vector.load %arg3[%c0_24, %c0_25, %c0_26] : memref<2x8x200xf32, #tpu.memory_space<vmem>>, vector<1x8x200xf32>
    %21 = vector.shape_cast %20 : vector<1x8x200xf32> to vector<8x200xf32>
    %22 = vector.shape_cast %19 : vector<8x200xf32> to vector<1x8x200xf32>
    tpu.vector_store %arg3[%c0_24, %c0_25, %c0_26], %22 {strides = array<i32>} : memref<2x8x200xf32, #tpu.memory_space<vmem>>, vector<1x8x200xf32>,
    %c1 = arith.constant 1 : index
    %c0_27 = arith.constant 0 : index
    %c0_28 = arith.constant 0 : index
    %23 = vector.load %arg1[%c1, %c0_27, %c0_28] : memref<2x3x200xf32, #tpu.memory_space<vmem>>, vector<1x3x200xf32>
    %24 = vector.shape_cast %23 : vector<1x3x200xf32> to vector<3x200xf32>
    %c0_29 = arith.constant 0 : index
    %c128_30 = arith.constant 128 : index
    %25 = vector.load %arg4[%c0_29, %c128_30] : memref<3x329xf32, #tpu.memory_space<vmem>>, vector<3x200xf32>
    tpu.vector_store %arg4[%c0_29, %c128_30], %24 {strides = array<i32>} : memref<3x329xf32, #tpu.memory_space<vmem>>, vector<3x200xf32>,
    %c0_31 = arith.constant 0 : index
    %c127_32 = arith.constant 127 : index
    %26 = vector.load %arg4[%c0_31, %c127_32] : memref<3x329xf32, #tpu.memory_space<vmem>>, vector<3x200xf32>
    %c0_33 = arith.constant 0 : index
    %c0_34 = arith.constant 0 : index
    %27 = vector.load %arg5[%c0_33, %c0_34] : memref<13x200xf32, #tpu.memory_space<vmem>>, vector<3x200xf32>
    tpu.vector_store %arg5[%c0_33, %c0_34], %26 {strides = array<i32>} : memref<13x200xf32, #tpu.memory_space<vmem>>, vector<3x200xf32>,
    %c0_35 = arith.constant 0 : index
    %c128_36 = arith.constant 128 : index
    %28 = vector.load %arg4[%c0_35, %c128_36] : memref<3x329xf32, #tpu.memory_space<vmem>>, vector<3x200xf32>
    %c4_37 = arith.constant 4 : index
    %c0_38 = arith.constant 0 : index
    %29 = vector.load %arg5[%c4_37, %c0_38] : memref<13x200xf32, #tpu.memory_space<vmem>>, vector<3x200xf32>
    tpu.vector_store %arg5[%c4_37, %c0_38], %28 {strides = array<i32>} : memref<13x200xf32, #tpu.memory_space<vmem>>, vector<3x200xf32>,
    %c0_39 = arith.constant 0 : index
    %c129_40 = arith.constant 129 : index
    %30 = vector.load %arg4[%c0_39, %c129_40] : memref<3x329xf32, #tpu.memory_space<vmem>>, vector<3x200xf32>
    %c8_41 = arith.constant 8 : index
    %c0_42 = arith.constant 0 : index
    %31 = vector.load %arg5[%c8_41, %c0_42] : memref<13x200xf32, #tpu.memory_space<vmem>>, vector<3x200xf32>
    tpu.vector_store %arg5[%c8_41, %c0_42], %30 {strides = array<i32>} : memref<13x200xf32, #tpu.memory_space<vmem>>, vector<3x200xf32>,
    %c0_43 = arith.constant 0 : index
    %c0_44 = arith.constant 0 : index
    %32 = vector.load %arg5[%c0_43, %c0_44] : memref<13x200xf32, #tpu.memory_space<vmem>>, vector<13x200xf32>
    %cst_45 = arith.constant dense<0.000000e+00> : vector<8x200xf32>
    %33 = tpu.matmul %6, %32, %cst_45 {dimension_numbers = #tpu.dot_dimension_numbers<[1], [0], [0], [1], [0, 0, 1, 1], [], []>} : vector<8x13xf32>, vector<13x200xf32>, vector<8x200xf32> -> vector<8x200xf32>
    %cst_46 = arith.constant 0.000000e+00 : f32
    %34 = vector.broadcast %cst_46 : f32 to vector<8x200xf32>
    %35 = arith.maximumf %33, %34 : vector<8x200xf32>
    %c1_47 = arith.constant 1 : index
    %c0_48 = arith.constant 0 : index
    %c0_49 = arith.constant 0 : index
    %36 = vector.load %arg3[%c1_47, %c0_48, %c0_49] : memref<2x8x200xf32, #tpu.memory_space<vmem>>, vector<1x8x200xf32>
    %37 = vector.shape_cast %36 : vector<1x8x200xf32> to vector<8x200xf32>
    %38 = vector.shape_cast %35 : vector<8x200xf32> to vector<1x8x200xf32>
    tpu.vector_store %arg3[%c1_47, %c0_48, %c0_49], %38 {strides = array<i32>} : memref<2x8x200xf32, #tpu.memory_space<vmem>>, vector<1x8x200xf32>,
    return
  }
  func.func @transform_0(%arg0: i32) -> (i32, i32, i32) {
    %c0_i32 = arith.constant 0 : i32
    %c0_i32_0 = arith.constant 0 : i32
    %c0_i32_1 = arith.constant 0 : i32
    return %arg0, %c0_i32, %c0_i32_0 : i32, i32, i32
  }
  func.func @transform_1(%arg0: i32) -> (i32, i32) {
    %c0_i32 = arith.constant 0 : i32
    %c0_i32_0 = arith.constant 0 : i32
    %c0_i32_1 = arith.constant 0 : i32
    return %c0_i32, %c0_i32_0 : i32, i32
  }
  func.func @transform_2(%arg0: i32) -> (i32, i32, i32) {
    %c0_i32 = arith.constant 0 : i32
    %c0_i32_0 = arith.constant 0 : i32
    %c0_i32_1 = arith.constant 0 : i32
    return %arg0, %c0_i32, %c0_i32_0 : i32, i32, i32
  }
}

</mosaic_0001>

<bundles_post_ra>
// kernel: conv_block_forward.1
= control target key start
LH: loop header
LB: loop body
LE: loop exit
PB: predicated region body
PF: predicated region fallthrough
CT: control target
= control target key end

     0   :  { %7 = vsyncpa [#allocation5], 0  ;;  %s814_s0 = inlined_call_operand.vmem [shape: f32[4,3,200], index: 0, kind: input, shape index: {}]   ;;  %s815_s1 = inlined_call_operand.vmem [shape: f32[8,13], index: 1, kind: input, shape index: {}]   ;;  %s816_s2 = inlined_call_operand.hbm [shape: f32[4,8,200], index: 2, kind: output, shape index: {}]  }
   0x1   :  { %9 = vsyncpa [#allocation5 + $0x1], 0  ;;  %s673_s9 = smov 0   ;;  %s675_s10 = smov 0  }
   0x2   :  { %s677_s11 = smov 0   ;;  %s679_s12 = smov 0  }
   0x3 LB: > { %s694_s13 = sadd.s32 4294967295, %s648_s12   ;;  %s499_s14 = sadd.s32 4294967294, %s648_s12   ;;  %s648_s12 = sphi %s679_s12, %s826_s12   ;;  %s644_s11 = sphi %s677_s11, %s825_s11   ;;  %s640_s10 = sphi %s675_s10, %s824_s10   ;;  %s636_s9 = sphi %s673_s9, %s823_s9  }
   0x4   : > { %s698_s15 = sadd.s32 1, %s648_s12   ;;  %s69_s16 = sadd.s32 1, %s644_s11 }
   0x5   : > { %s66_s17 = ssub.s32 %s648_s12, %s698_s15  ;;  %p79_p0 = scmp.ne.s32.totalorder %s644_s11, %s640_s10 }
   0x6   : > { %p67_p1 = scmp.eq.s32.totalorder %s66_s17, 0  ;;  %p80_p2 = scmp.eq.s32.totalorder %s694_s13, 1 }
   0x7   : > { %p85_p3 = scmp.ne.s32.totalorder %s640_s10, %s636_s9  ;;  %p86_p4 = scmp.eq.s32.totalorder %s499_s14, 1 }
   0x8   : > { %s709_s18 = scalar_select %p67_p1, %s644_s11, %s69_s16  }
   0x9   : > { %p711_p5 = por %p80_p2, %p79_p0  ;;  %p715_p6 = por %p86_p4, %p85_p3 }
   0xa   : > { %p502_p7 = scmp.ge.s32.totalorder %s648_s12, 1  ;;  %p117_p8 = scmp.lt.s32.totalorder %s648_s12, 3 }
   0xc   : > { %p118_p9 = pnand %p502_p7, %p117_p8 }
   0xd   : > { %s504_s21 = sshll.u32 (!%p118_p9), %s694_s13, 1  ;;  %vm149_vm0 = vcmask (!%p118_p9), 591872   ;;  %v650_v0 = vmov (!%p118_p9), 0.0   ;;  %vm166_vm1 = vcmask (!%p118_p9), 1042432   ;;  %vm167_vm2 = vcmask (!%p118_p9), 587780   ;;  %s652_s26 = smov (!%p118_p9), 1  }
   0xe   : > { %121 = sbr.rel (%p118_p9) target bundleno = 410 (0x19a), region = 28  ;;  %p141_p10 = scmp.lt.s32.totalorder (!%p118_p9), %s504_s21, 3  ;;  %148 = vst [vmem:[#allocation2] sm:$0x77] (!%p118_p9), %v650_v0  ;;  %150 = vst.msk [vmem:[#allocation2 + $0x8] sm:$0x7] (!%p118_p9), %vm149_vm0, %v650_v0  ;;  %287 = vmatprep.mubr.f32.mxu0 (!%p118_p9), %v650_v0  ;;  %410 = vmatprep.mubr.f32.mxu1 (!%p118_p9), %v650_v0  ;;  %v157_v3 = vlaneseq (!%p118_p9) }
   0xf   : > { %151 = vst [vmem:[#allocation3] sm:$0xff] (!%p118_p9), %v650_v0  ;;  %154 = vst [vmem:[#allocation3 + $0x10] sm:$0x1f] (!%p118_p9), %v650_v0  ;;  %vm152_vm4 = vcmask (!%p118_p9), 588800   ;;  %vm155_vm5 = vcmask (!%p118_p9), 585728   ;;  %v651_v4 = vmov (!%p118_p9), 1.0  }
  0x10   : > { %vm723_vm3 = vmor (!%p118_p9), %vm167_vm2, %vm166_vm1  ;;  %153 = vst.msk [vmem:[#allocation3 + $0x8] sm:$0xff] (!%p118_p9), %vm152_vm4, %v650_v0  ;;  %vm159_vm6 = vcmp.lt.s32.totalorder (!%p118_p9), %v157_v3, 200  ;;  %s653_s27 = smov (!%p118_p9), 127   ;;  %vm181_vm7 = vcmask (!%p118_p9), 7168   ;;  %vm187_vm8 = vcmask (!%p118_p9), 583680   ;;  %vm202_vm9 = vcmask (!%p118_p9), 1039360  }
  0x11   : > { %156 = vst.msk [vmem:[#allocation3 + $0x18] sm:$0x1f] (!%p118_p9), %vm155_vm5, %v650_v0  ;;  %vm216_vm10 = vcmask (!%p118_p9), 1044480   ;;  %vm654_vm11 = vmmov (!%p118_p9), 1   ;;  %v164_v43 = vld [vmem:[%s815_s1] sm:$0xff] (!%p118_p9)  ;;  %vm212_vm13 = vcmask (!%p118_p9), 105472  }
  0x12   : > { %162 = vst.msk [vmem:[#allocation3 + $0x14] ss:$8 sm:$0x3] (!%p118_p9), %vm159_vm6, %v651_v4  ;;  %vm745_vm12 = vmpackc.low (!%p118_p9), %vm216_vm10, %vm654_vm11  ;;  %s137_s30 = sand.u32 (!%p118_p9), 1, %s640_s10   ;;  %s524_s6 = sshll.u32 (!%p118_p9), %s694_s13, 9 }
  0x13   : > { %s503_s3 = sshll.u32 (!%p118_p9), %s137_s30, 5  ;;  %s770_s14 = scalar_lea.hbm (!%p118_p9), %s816_s2, %s524_s6 }
  0x14   : > { %s139_s4 = scalar_lea.vmem (!%p118_p9), [#allocation4], %s503_s3  ;;  %s773_s16 = scalar_lea.sflag (!%p118_p9), [#allocation5], %s137_s30 }
  0x15   : > { %s828_s21 = smov (!%p141_p10, %s504_s21), 3  ;;  %s437_s5 = sshll.u32 %s139_s4, 4  ;;  %s765_s5 = int_to_ptr.vmem [resolvable:$true] %s437_s5 }
  0x16   : > { %s522_s22 = sshll.u32 %s828_s21, 3  ;;  %s586_s13 = scalar_lea.vmem %s765_s5, 512 }
  0x17   : > { %s145_s25 = scalar_lea.vmem %s814_s0, %s522_s22  ;;  %p587_p11 = scmp.ne.s32.totalorder %s765_s5, %s586_s13 }
  0x18   : > { %v165_v2 = vld [vmem:[%s145_s25] sm:$0x77]  ;;  %v510_v5 = vld [vmem:[%s145_s25 + $0x8] sm:$0x77]  ;;  %s655_s17 = smov [#allocation4]  }
  0x19   : > { %169 = vst.msk [vmem:[#allocation2 + $0x4] sm:$0x77] %vm723_vm3, %v165_v2  ;;  %p588_p12 = pnand %p587_p11, %p711_p5  ;;  %s590_s21 = sshll.u32 %s655_s17, 4  ;;  %s591_s21 = int_to_ptr.vmem [resolvable:$false] %s590_s21 }
  0x1a   : > { %s592_s22 = scalar_lea.vmem %s591_s21, 1024  ;;  %p593_p0 = scmp.lt.s32.totalorder %s765_s5, %s591_s21 }
  0x1b   : > { %p589_p13 = pneg %p588_p12  ;;  %p594_p1 = scmp.lt.s32.totalorder %s592_s22, %s586_s13 }
  0x1d   : > { %p595_p2 = por %p594_p1, %p593_p0 }
  0x1f   : > { %p596_p3 = pnand %p595_p2, %p589_p13 }
  0x20   : > { %v171_v6 = vld [vmem:[#allocation2 + $0x8] sm:$0x7]  ;;  %v170_v7 = vld [vmem:[#allocation2] sm:$0x77] }
  0x21   : > { %v189_v8 = vld [vmem:[#allocation2 + $0x4] sm:$0x77]  ;;  %179 = vrot.lane.b32.xlu0 %v171_v6, %s652_s26  ;;  %175 = vrot.lane.b32.xlu1 %v170_v7, %s652_s26  ;;  %v174_v10 = vcombine.high %v170_v7, %v170_v7 }
  0x22   : > { %v195_v9 = vld [vmem:[#allocation2 + $0x4] sm:$0x77]  ;;  %194 = vst.msk [vmem:[#allocation3 + $0x8] sm:$0x70] %vm167_vm2, %v189_v8  ;;  %v191_v11 = vcombine.low %v189_v8, %v189_v8 }
  0x23   : > { %300 = vst.msk [vmem:[#allocation2 + $0x4] sm:$0x77] %vm723_vm3, %v510_v5  ;;  %v197_v12 = vcombine.high %v195_v9, %v195_v9 }
  0x24   : > { %193 = vst [vmem:[#allocation3] sm:$0x70] %v191_v11 }
  0x25   : > { %198 = vrot.lane.b32.xlu1 %v195_v9, %s653_s27  ;;  %177 = vrot.lane.b32.xlu0 %v174_v10, %s652_s26 }
  0x29   : > { %200 = vrot.lane.b32.xlu0 %v197_v12, %s653_s27 }
  0x2a   : > { %v301_v13 = vld [vmem:[#allocation2] sm:$0x77]  ;;  %v302_v15 = vld [vmem:[#allocation2 + $0x8] sm:$0x7] }
  0x2b   : > { %306 = vrot.lane.b32.xlu1 %v301_v13, %s652_s26  ;;  %v305_v14 = vcombine.high %v301_v13, %v301_v13  ;;  %v324_v16 = vld [vmem:[#allocation2 + $0x4] sm:$0x77] }
  0x2c   : > { %v326_v17 = vcombine.high %v324_v16, %v324_v16  ;;  %v318_v24 = vld [vmem:[#allocation2 + $0x4] sm:$0x77] }
  0x2d   : > { %310 = vrot.lane.b32.xlu0 %v302_v15, %s652_s26  ;;  %v320_v28 = vcombine.low %v318_v24, %v318_v24 }
  0x2f   : > { %308 = vrot.lane.b32.xlu1 %v305_v14, %s652_s26 }
  0x31   : > { %327 = vrot.lane.b32.xlu0 %v324_v16, %s653_s27 }
  0x33   : > { %329 = vrot.lane.b32.xlu1 %v326_v17, %s653_s27 }
  0x93   : > { %v180_v18 = vpop.permute.xlu0 %179  ;;  %v176_v19 = vpop.permute.xlu1 %175 }
  0x97   : > { %v199_v20 = vpop.permute.xlu1 %198  ;;  %v178_v21 = vpop.permute.xlu0 %177 }
  0x98   : > { %v182_v22 = vsel %vm181_vm7, %v176_v19, %v178_v21  ;;  %v183_v23 = vsel %vm181_vm7, %v178_v21, %v180_v18 }
  0x99   : > { %186 = vst [vmem:[#allocation3] sm:$0x7] %v182_v22  ;;  %188 = vst.msk [vmem:[#allocation3 + $0x8] sm:$0x7] %vm187_vm8, %v183_v23 }
  0x9b   : > { %v201_v25 = vpop.permute.xlu0 %200 }
  0x9c   : > { %v203_v27 = vsel %vm202_vm9, %v199_v20, %v201_v25  ;;  %207 = vst.msk [vmem:[#allocation3 + $0x18] sm:$0x7] %vm187_vm8, %v201_v25 }
  0x9d   : > { %v307_v26 = vpop.permute.xlu1 %306  ;;  %206 = vst [vmem:[#allocation3 + $0x10] sm:$0x7] %v203_v27 }
  0x9f   : > { %v311_v29 = vpop.permute.xlu0 %310 }
  0xa0   : > { %v208_v31 = vld [vmem:[#allocation3] sm:$0xff]  ;;  %v209_v32 = vld [vmem:[#allocation3 + $0x8] sm:$0xff] }
  0xa1   : > { %v309_v30 = vpop.permute.xlu1 %308  ;;  %322 = vst [vmem:[#allocation3] sm:$0x70] %v320_v28  ;;  %323 = vst.msk [vmem:[#allocation3 + $0x8] sm:$0x70] %vm167_vm2, %v318_v24 }
  0xa2   : > { %v312_v33 = vsel %vm181_vm7, %v307_v26, %v309_v30  ;;  %v313_v34 = vsel %vm181_vm7, %v309_v30, %v311_v29 }
  0xa3   : > { %316 = vst [vmem:[#allocation3] sm:$0x7] %v312_v33  ;;  %317 = vst.msk [vmem:[#allocation3 + $0x8] sm:$0x7] %vm187_vm8, %v313_v34  ;;  %v328_v35 = vpop.permute.xlu0 %327  ;;  %v211_v36 = vld [vmem:[#allocation3 + $0x18] sm:$0x1f] }
  0xa4   : > { %v210_v39 = vld [vmem:[#allocation3 + $0x10] sm:$0x1f]  ;;  %v525_v40 = vpack.c.bf16 %v211_v36, %v209_v32 }
  0xa5   : > { %v330_v38 = vpop.permute.xlu1 %329  ;;  %v528_v42 = vpack.c.bf16 %v210_v39, %v208_v31 }
  0xa6   : > { %v331_v41 = vsel %vm202_vm9, %v328_v35, %v330_v38  ;;  %335 = vst.msk [vmem:[#allocation3 + $0x18] sm:$0x7] %vm187_vm8, %v330_v38  ;;  %527 = vmatprep.subr.msk.bf16.mxu0 %vm745_vm12, %v525_v40 }
  0xa7   : > { %334 = vst [vmem:[#allocation3 + $0x10] sm:$0x7] %v331_v41  ;;  %530 = vmatpush1.bf16.msk.msra.mxu0 %vm745_vm12, %v528_v42 }
  0xaa   : > { %509 = vmatmul.mubr.msk.f32.vlgmr.msra.gmra.mrb[0].mxu0 %vm212_vm13, %v164_v43  ;;  %v337_v44 = vld [vmem:[#allocation3 + $0x8] sm:$0xff]  ;;  %v336_v47 = vld [vmem:[#allocation3] sm:$0xff] }
  0xad   : > { %v339_v45 = vld [vmem:[#allocation3 + $0x18] sm:$0x1f] }
  0xae   : > { %v531_v46 = vpack.c.bf16 %v339_v45, %v337_v44  ;;  %v338_v48 = vld [vmem:[#allocation3 + $0x10] sm:$0x1f] }
  0xaf   : > { %v534_v49 = vpack.c.bf16 %v338_v48, %v336_v47 }
  0xb0   : > { %533 = vmatprep.subr.msk.bf16.mxu1 %vm745_vm12, %v531_v46 }
  0xb1   : > { %536 = vmatpush1.bf16.msk.msra.mxu1 %vm745_vm12, %v534_v49 }
  0xb4   : > { %513 = vmatmul.mubr.msk.f32.vlgmr.msra.gmra.mrb[0].mxu1 %vm212_vm13, %v164_v43 }
 0x17d   : > { %v289_v50 = vpop.f32.mrb[0].mxu0 }
 0x17e   : > { %v294_v51 = vmax.f32 %v289_v50, 0.0  ;;  %v291_v52 = vpop.f32.mrb[1].mxu0 }
 0x17f   : > { %v295_v53 = vmax.f32 %v291_v52, 0.0 }
 0x180   : > { %296 = vst [vmem:[%s139_s4] sm:$0xff] %v294_v51 }
 0x181   : > { %297 = vst.msk [vmem:[%s139_s4 + $0x8] sm:$0xff] %vm152_vm4, %v295_v53 }
 0x187   : > { %v412_v54 = vpop.f32.mrb[0].mxu1 }
 0x188   : > { %v417_v55 = vmax.f32 %v412_v54, 0.0  ;;  %v414_v56 = vpop.f32.mrb[1].mxu1 }
 0x189   : > { %v418_v57 = vmax.f32 %v414_v56, 0.0 }
 0x18a   : > { %514 = vst [vmem:[%s139_s4 + $0x10] sm:$0xff] %v417_v55 }
 0x18b   : > { %515 = vst.msk [vmem:[%s139_s4 + $0x18] sm:$0xff] %vm152_vm4, %v418_v57 }
 0x18c   : > { %599 = shalt.err (!%p596_p3)
}
 0x18d   : > { %s600_s23 = scalar_lea.hbm %s770_s14, 512  ;;  %s604_s26 = scalar_lea.hbm %s816_s2, 1024 }
 0x18e   : > { %p601_p4 = scmp.ne.s32.totalorder %s770_s14, %s600_s23  ;;  %p605_p9 = scmp.lt.u32.totalorder %s770_s14, %s816_s2 }
 0x18f   : > { %p606_p10 = scmp.lt.u32.totalorder %s604_s26, %s600_s23  ;;  %p608_p12 = scmp.lt.u32.totalorder %s600_s23, %s770_s14 }
 0x190   : > { %p602_p7 = pnand %p601_p4, %p711_p5 }
 0x191   : > { %p607_p11 = por %p606_p10, %p605_p9 }
 0x192   : > { %p603_p8 = pneg %p602_p7 }
 0x193   : > { %p609_p13 = por %p608_p12, %p607_p11 }
 0x195   : > { %p610_p0 = pnand %p609_p13, %p603_p8 }
 0x197   : > { %613 = shalt.err (!%p610_p0)
}
 0x198   : > { %s656_s29 = smov 256   ;;  %s657_s30 = smov 16  }
 0x199   : > { %537 = dma.vmem_to_hbm [thread:$0]  (%p711_p5), %s765_s5, 512, %s770_s14, %s773_s16, %s656_s29, %s656_s29, %s657_s30  }
 0x19a PF: > { %p543_p1 = scmp.ge.s32.totalorder %s648_s12, 2  ;;  %s452_s3 = sand.u32 1, %s636_s9  }
 0x19b   : > { %s453_s4 = scalar_lea.sflag [#allocation5], %s452_s3 }
 0x19c   : > { %p540_p2 = pnand %p543_p1, %p715_p6 }
 0x19e   : > { %631 = dma.done.wait (!%p540_p2), %s453_s4, 512  }
 0x19f   : > { %633 = vsyncadd (!%p540_p2), %s453_s4, 4294966784  ;;  %p12_p3 = scmp.ge.s32.totalorder %s698_s15, 4   ;;  %s823_s9 = smov %s640_s10 }
 0x1a0   : > { %s824_s10 = smov %s644_s11  ;;  %s825_s11 = smov %s709_s18 }
 0x1a1   : > { %s826_s12 = smov %s698_s15  ;;  %14 = sbr.rel (!%p12_p3) target bundleno = 3 (0x3), region = 66 }
 0x1a8   :  { %458 = vsyncpa [#allocation5], 1 }
 0x1a9   :  { %460 = vsyncpa [#allocation5 + $0x1], 1 }

</bundles_post_ra>
